<compile_context>
chip_gen: v7x
topology: tpu7x:2x2x1
jax: 0.10.0
libtpu: 0.0.40
codegen_flags: <defaults>
</compile_context>

<pallas_src>
import math

import jax
import jax.numpy as jnp
from jax.experimental import pallas as pl
from jax.experimental.pallas import tpu as pltpu


# ----------------------------- kernel ----------------------------------------


def _add_kernel(x_ref, pe_ref, o_ref):
    # x_ref: (B, tw) or (B, S, D); pe_ref: (1, tw) or (1, S, D)
    # pe broadcasts over the batch dimension.
    o_ref[...] = x_ref[...] + pe_ref[...]


# ----------------------------- helpers ----------------------------------------


def _round_up(a, m):
    return (a + m - 1) // m * m


def _pick_flat_tile(B, N, itemsize, budget_bytes):
    """Lane-tile width (multiple of 128) for the flattened (B, N) layout.

    Resident VMEM ~= 2 double-buffered copies of (x block + out block + pe
    block) = 2 * (2*B + 1) * tw * itemsize."""
    denom = 2 * (2 * B + 1) * itemsize
    tw = max(128, budget_bytes // denom // 128 * 128)
    if N >= 256:
        # Keep at least 2 blocks on the parallel axis so dual-TC parts (v7x)
        # get work on both cores.
        tw = min(tw, _round_up(_round_up(N, 2) // 2, 128))
    return min(tw, _round_up(N, 128))


def make_positional_encoding_table(d_model, max_seq_length=1024,
                                   dtype=jnp.float32):
    """Matches the PyTorch buffer: interleaved sin/cos, shape (1, L, D)."""
    assert d_model % 2 == 0, "PositionalEncoding requires an even d_model"
    position = jnp.arange(max_seq_length, dtype=jnp.float32)[:, None]
    div_term = jnp.exp(
        jnp.arange(0, d_model, 2, dtype=jnp.float32)
        * (-math.log(10000.0) / d_model)
    )
    angles = position * div_term                                  # (L, D/2)
    pe = jnp.stack([jnp.sin(angles), jnp.cos(angles)], axis=-1)   # (L, D/2, 2)
    pe = pe.reshape(max_seq_length, d_model)                      # interleaved
    return pe[None].astype(dtype)                                 # (1, L, D)


# ----------------------------- wrapper ----------------------------------------


def positional_encoding(x, pe, *, small_bytes_threshold=1 << 20,
                        block_budget_bytes=12 << 20):
    """x: (B, S, D); pe: (1, max_seq_length, D). Returns x + pe[:, :S]."""
    B, S, D = x.shape
    assert pe.ndim == 3 and pe.shape[0] == 1 and pe.shape[2] == D
    max_seq = pe.shape[1]
    assert S <= max_seq, "sequence length exceeds max_seq_length"

    if pe.dtype != x.dtype:
        pe = pe.astype(x.dtype)   # buffer should be pre-stored in x's dtype

    itemsize = jnp.dtype(x.dtype).itemsize
    total_bytes = B * S * D * itemsize
    # x read once, out written once, pe read once (grid reuses the pe block).
    cost = pl.CostEstimate(flops=B * S * D, transcendentals=0,
                           bytes_accessed=(2 * B * S * D + S * D) * itemsize)
    cparams = pltpu.CompilerParams(
        dimension_semantics=("parallel",),
        vmem_limit_bytes=32 << 20,   # <= half of v7x's 64 MiB physical VMEM
    )

    # ---- small-problem fast path: one full-extent block, one grid step ------
    if total_bytes <= small_bytes_threshold:
        pe_s = pe[:, :S, :]   # tiny static slice; negligible at this size
        return pl.pallas_call(
            _add_kernel,
            grid=(1,),
            in_specs=[pl.BlockSpec((B, S, D), lambda i: (0, 0, 0)),
                      pl.BlockSpec((1, S, D), lambda i: (0, 0, 0))],
            out_specs=pl.BlockSpec((B, S, D), lambda i: (0, 0, 0)),
            out_shape=jax.ShapeDtypeStruct((B, S, D), x.dtype),
            compiler_params=cparams,
            cost_estimate=cost,
        )(x, pe_s)

    # ---- main path: lane-dense flattened layout, pe read once --------------
    N = S * D
    x2 = x.reshape(B, N)                  # free row-major reshape
    pe2 = pe.reshape(1, max_seq * D)      # full table; no per-call slice/copy

    tw = _pick_flat_tile(B, N, itemsize, block_budget_bytes)
    grid = (pl.cdiv(N, tw),)              # partial edge block masked by Pallas

    out2 = pl.pallas_call(
        _add_kernel,
        grid=grid,
        in_specs=[
            pl.BlockSpec((B, tw), lambda n: (0, n)),   # x: full batch per step
            pl.BlockSpec((1, tw), lambda n: (0, n)),   # pe: same flat offsets
        ],
        out_specs=pl.BlockSpec((B, tw), lambda n: (0, n)),
        out_shape=jax.ShapeDtypeStruct((B, N), x.dtype),
        compiler_params=cparams,
        cost_estimate=cost,
    )(x2, pe2)
    return out2.reshape(B, S, D)


# ----------------------------- reference --------------------------------------


def reference_forward(x, pe):
    S = x.shape[1]
    return x + pe[:, :S]


# ------------------------------- main ------------------------------------------


if __name__ == "__main__":
    MAX_SEQ = 1024
    key = jax.random.PRNGKey(0)

    # Small shapes consistent with the module (exercises the fast path).
    B, S, D = 2, 8, 32
    x = jax.random.normal(key, (B, S, D), dtype=jnp.float32)
    pe = make_positional_encoding_table(D, MAX_SEQ, dtype=jnp.float32)

    y = positional_encoding(x, pe)
    jax.block_until_ready(y)
    y_ref = reference_forward(x, pe)
    assert y.shape == (B, S, D)
    assert jnp.allclose(y, y_ref, atol=1e-6, rtol=1e-6)

    # Also exercise the tiled lane-dense path (threshold=0 forces it), with an
    # unaligned flattened length so the partial edge block / pe-broadcast path
    # is covered too.
    B2, S2, D2 = 2, 65, 48
    x2 = jax.random.normal(jax.random.PRNGKey(0), (B2, S2, D2),
                           dtype=jnp.float32)
    pe2 = make_positional_encoding_table(D2, MAX_SEQ, dtype=jnp.float32)
    y2 = positional_encoding(x2, pe2, small_bytes_threshold=0)
    jax.block_until_ready(y2)
    assert jnp.allclose(y2, reference_forward(x2, pe2), atol=1e-6, rtol=1e-6)

    print("KERNEL_OK")
</pallas_src>

<mosaic_0001>
module attributes {stable_mosaic.version = 11 : i64} {
  func.func @_add_kernel(%arg0: i32, %arg1: memref<2x8x32xf32, #tpu.memory_space<vmem>>, %arg2: memref<1x8x32xf32, #tpu.memory_space<vmem>>, %arg3: memref<2x8x32xf32, #tpu.memory_space<vmem>>) attributes {dimension_semantics = [#tpu.dimension_semantics<parallel>], iteration_bounds = array<i64: 1>, scalar_prefetch = 0 : i64, scratch_operands = 0 : i64, tpu.core_type = #tpu.core_type<tc>, window_params = [{pipeline_mode = #tpu.pipeline_mode<synchronous>, transform_indices = @transform_0, window_bounds = array<i64: 2, 8, 32>}, {pipeline_mode = #tpu.pipeline_mode<synchronous>, transform_indices = @transform_1, window_bounds = array<i64: 1, 8, 32>}, {pipeline_mode = #tpu.pipeline_mode<synchronous>, transform_indices = @transform_2, window_bounds = array<i64: 2, 8, 32>}]} {
    %c0 = arith.constant 0 : index
    %c0_0 = arith.constant 0 : index
    %c0_1 = arith.constant 0 : index
    %0 = vector.load %arg1[%c0, %c0_0, %c0_1] : memref<2x8x32xf32, #tpu.memory_space<vmem>>, vector<2x8x32xf32>
    %c0_2 = arith.constant 0 : index
    %c0_3 = arith.constant 0 : index
    %c0_4 = arith.constant 0 : index
    %1 = vector.load %arg2[%c0_2, %c0_3, %c0_4] : memref<1x8x32xf32, #tpu.memory_space<vmem>>, vector<1x8x32xf32>
    %2 = vector.broadcast %1 : vector<1x8x32xf32> to vector<2x8x32xf32>
    %3 = arith.addf %0, %2 : vector<2x8x32xf32>
    %c0_5 = arith.constant 0 : index
    %c0_6 = arith.constant 0 : index
    %c0_7 = arith.constant 0 : index
    %4 = vector.load %arg3[%c0_5, %c0_6, %c0_7] : memref<2x8x32xf32, #tpu.memory_space<vmem>>, vector<2x8x32xf32>
    tpu.vector_store %arg3[%c0_5, %c0_6, %c0_7], %3 {strides = array<i32>} : memref<2x8x32xf32, #tpu.memory_space<vmem>>, vector<2x8x32xf32>,
    return
  }
  func.func @transform_0(%arg0: i32) -> (i32, i32, i32) {
    %c0_i32 = arith.constant 0 : i32
    %c0_i32_0 = arith.constant 0 : i32
    %c0_i32_1 = arith.constant 0 : i32
    %c0_i32_2 = arith.constant 0 : i32
    return %c0_i32, %c0_i32_0, %c0_i32_1 : i32, i32, i32
  }
  func.func @transform_1(%arg0: i32) -> (i32, i32, i32) {
    %c0_i32 = arith.constant 0 : i32
    %c0_i32_0 = arith.constant 0 : i32
    %c0_i32_1 = arith.constant 0 : i32
    %c0_i32_2 = arith.constant 0 : i32
    return %c0_i32, %c0_i32_0, %c0_i32_1 : i32, i32, i32
  }
  func.func @transform_2(%arg0: i32) -> (i32, i32, i32) {
    %c0_i32 = arith.constant 0 : i32
    %c0_i32_0 = arith.constant 0 : i32
    %c0_i32_1 = arith.constant 0 : i32
    %c0_i32_2 = arith.constant 0 : i32
    return %c0_i32, %c0_i32_0, %c0_i32_1 : i32, i32, i32
  }
}

</mosaic_0001>

<bundles_post_ra>
// kernel: tpu_custom_call.1
= control target key start
LH: loop header
LB: loop body
LE: loop exit
PB: predicated region body
PF: predicated region fallthrough
CT: control target
= control target key end

     0   :  { %7 = vsyncpa [#allocation3], 0  ;;  %s203_s0 = inlined_call_operand.hbm [shape: f32[2,8,32], index: 0, kind: input, shape index: {}]   ;;  %s204_s1 = inlined_call_operand.hbm [shape: f32[1,8,32], index: 1, kind: input, shape index: {}]   ;;  %s205_s2 = inlined_call_operand.hbm [shape: f32[2,8,32], index: 2, kind: output, shape index: {}]  }
   0x1   :  { %8 = vsyncpa [#allocation6], 0 }
   0x2   :  { %9 = vsyncpa [#allocation4], 0  ;;  %s141_s9 = smov [#allocation2]   ;;  %s69_s13 = scalar_lea.hbm %s203_s0, 256 }
   0x3   :  { %s15_s10 = sshll.u32 %s141_s9, 4  ;;  %p70_p0 = scmp.ne.s32.totalorder %s203_s0, %s69_s13  ;;  %s16_s10 = int_to_ptr.vmem [resolvable:$true] %s15_s10 }
   0x4   :  { %p73_p1 = scmp.lt.u32.totalorder %s69_s13, %s203_s0 }
   0x6   :  { %p75_p2 = pnand %p73_p1, %p70_p0 }
   0x8   :  { %78 = shalt.err (!%p75_p2)
}
   0x9   :  { %s79_s18 = scalar_lea.vmem %s16_s10, 256  ;;  %p84_p4 = scmp.lt.s32.totalorder %s16_s10, %s16_s10 }
   0xa   :  { %p80_p3 = scmp.ne.s32.totalorder %s16_s10, %s79_s18  ;;  %p85_p5 = scmp.lt.s32.totalorder %s79_s18, %s79_s18 }
   0xc   :  { %p86_p6 = por %p85_p5, %p84_p4 }
   0xe   :  { %p87_p7 = pnand %p86_p6, %p80_p3 }
  0x10   :  { %90 = shalt.err (!%p87_p7)
}
  0x11   :  { %s142_s19 = smov 128   ;;  %s143_s20 = smov 8  }
  0x12   :  { %21 = dma.hbm_to_vmem [thread:$0]  %s203_s0, 256, %s16_s10, [#allocation3], %s142_s19, %s142_s19, %s143_s20  }
  0x13   :  { %s144_s23 = smov [#allocation5]   ;;  %s91_s27 = scalar_lea.hbm %s204_s1, 128 }
  0x14   :  { %s28_s24 = sshll.u32 %s144_s23, 4  ;;  %p92_p8 = scmp.ne.s32.totalorder %s204_s1, %s91_s27  ;;  %s29_s24 = int_to_ptr.vmem [resolvable:$true] %s28_s24 }
  0x15   :  { %p95_p9 = scmp.lt.u32.totalorder %s91_s27, %s204_s1 }
  0x17   :  { %p97_p10 = pnand %p95_p9, %p92_p8 }
  0x19   :  { %100 = shalt.err (!%p97_p10)
}
  0x1a   :  { %s101_s4 = scalar_lea.vmem %s29_s24, 128  ;;  %p106_p12 = scmp.lt.s32.totalorder %s29_s24, %s29_s24 }
  0x1b   :  { %p102_p11 = scmp.ne.s32.totalorder %s29_s24, %s101_s4  ;;  %p107_p13 = scmp.lt.s32.totalorder %s101_s4, %s101_s4 }
  0x1d   :  { %p108_p0 = por %p107_p13, %p106_p12 }
  0x1f   :  { %p109_p1 = pnand %p108_p0, %p102_p11 }
  0x21   :  { %112 = shalt.err (!%p109_p1)
}
  0x22   :  { %31 = dma.hbm_to_vmem [thread:$0]  %s204_s1, 128, %s29_s24, [#allocation6]  }
  0x23   :  { %135 = dma.done.wait [#allocation3], 256  }
  0x24   :  { %136 = vsyncadd [#allocation3], 4294967040 }
  0x25   :  { %137 = dma.done.wait [#allocation6], 128  }
  0x26   :  { %138 = vsyncadd [#allocation6], 4294967168  ;;  %s145_s6 = smov [#allocation7]   ;;  %v38_v0 = vld [vmem:[#allocation2] sm:$0xff]  ;;  %v40_v1 = vld [vmem:[#allocation5] sm:$0xff]  ;;  %vm43_vm0 = vcmask 261120  }
  0x27   :  { %s51_s7 = sshll.u32 %s145_s6, 4  ;;  %v39_v2 = vld [vmem:[#allocation2 + $0x8] sm:$0xff]  ;;  %v41_v3 = vadd.f32 %v40_v1, %v38_v0  ;;  %s52_s7 = int_to_ptr.vmem [resolvable:$true] %s51_s7 }
  0x28   :  { %v42_v4 = vadd.f32 %v40_v1, %v39_v2  ;;  %s113_s8 = scalar_lea.vmem %s52_s7, 256  ;;  %p118_p3 = scmp.lt.s32.totalorder %s52_s7, %s52_s7 }
  0x29   :  { %44 = vst.msk [vmem:[#allocation7] sm:$0xff] %vm43_vm0, %v41_v3  ;;  %p114_p2 = scmp.ne.s32.totalorder %s52_s7, %s113_s8  ;;  %p119_p4 = scmp.lt.s32.totalorder %s113_s8, %s113_s8 }
  0x2a   :  { %45 = vst.msk [vmem:[#allocation7 + $0x8] sm:$0xff] %vm43_vm0, %v42_v4 }
  0x2b   :  { %p120_p5 = por %p119_p4, %p118_p3 }
  0x2d   :  { %p121_p6 = pnand %p120_p5, %p114_p2 }
  0x2f   :  { %124 = shalt.err (!%p121_p6)
}
  0x30   :  { %s125_s10 = scalar_lea.hbm %s205_s2, 256 }
  0x31   :  { %p126_p7 = scmp.ne.s32.totalorder %s205_s2, %s125_s10  ;;  %p129_p8 = scmp.lt.u32.totalorder %s125_s10, %s205_s2 }
  0x33   :  { %p131_p9 = pnand %p129_p8, %p126_p7 }
  0x35   :  { %134 = shalt.err (!%p131_p9)
}
  0x36   :  { %57 = dma.vmem_to_hbm [thread:$0]  %s52_s7, 256, %s205_s2, [#allocation4], %s142_s19, %s142_s19, %s143_s20  }
  0x37   :  { %139 = dma.done.wait [#allocation4], 256  }
  0x38   :  { %140 = vsyncadd [#allocation4], 4294967040 }
  0x39   :  { %61 = vsyncpa [#allocation3], 1 }
  0x3a   :  { %62 = vsyncpa [#allocation6], 1 }
  0x3b   :  { %63 = vsyncpa [#allocation4], 1 }

</bundles_post_ra>
